<compile_context>
chip_gen: v7x
topology: tpu7x:2x2x1
jax: 0.10.0
libtpu: 0.0.40
codegen_flags: <defaults>
</compile_context>

<pallas_src>
import jax
import jax.numpy as jnp
from jax.experimental import pallas as pl
from jax.experimental.pallas import tpu as pltpu


def _round_up(x, m):
    return (x + m - 1) // m * m


# ----------------------------------------------------------------------------
# Pallas kernel: fused MLP head (Linear -> ReLU -> Linear) + row-wise L2 norm
# ----------------------------------------------------------------------------
def _mlp_l2norm_kernel(x_ref, w1_ref, b1_ref, w2_ref, b2_ref, o_ref):
    # Linear 1 + ReLU (MXU matmul, f32 accumulation; epilogue in f32).
    x = x_ref[...]
    h = jnp.dot(x, w1_ref[...], preferred_element_type=jnp.float32)
    h = jnp.maximum(h + b1_ref[...].astype(jnp.float32), 0.0)

    # Dropout: identity (module runs in eval mode inside JointModel.forward).

    # Linear 2 (cast activations to the weight dtype so bf16 weights hit the
    # MXU's native bf16 path; accumulation stays f32).
    y = jnp.dot(h.astype(w2_ref.dtype), w2_ref[...],
                preferred_element_type=jnp.float32)
    y = y + b2_ref[...].astype(jnp.float32)

    # L2 normalize along the last dim.  Padded columns are exactly zero, so
    # the sum over the lane-dense (padded) dim equals the true norm.  rsqrt
    # runs on the EUP slot instead of a VPU sqrt + divide.
    inv = jax.lax.rsqrt(jnp.sum(y * y, axis=-1, keepdims=True))
    o_ref[...] = (y * inv).astype(o_ref.dtype)


def mlp_l2norm(x, w1, b1, w2, b2, *, tile_n=512):
    """x: [N, D_in] -> [N, F], L2-normalized per row.

    Tiles the row dimension (double-buffered pipeline, parallel across TCs),
    keeps weights resident, and pads the hidden / output dims of the weights
    to multiples of 128 (zeros) so the kernel's output is lane-dense.
    """
    n, d = x.shape
    d_in, hdim = w1.shape
    _, fdim = w2.shape
    assert d == d_in and w2.shape[0] == hdim

    # Lane-dense zero padding of the matmul output dims (exact zeros -> the
    # math and the L2 norm are unchanged).  For real backbone dims (ResNet
    # 512/2048, BERT 768) these pads are no-ops.
    h_pad = _round_up(hdim, 128)
    f_pad = _round_up(fdim, 128)
    w1p = jnp.pad(w1, ((0, 0), (0, h_pad - hdim)))
    b1p = jnp.pad(b1.reshape(1, -1), ((0, 0), (0, h_pad - hdim)))
    w2p = jnp.pad(w2, ((0, h_pad - hdim), (0, f_pad - fdim)))
    b2p = jnp.pad(b2.reshape(1, -1), ((0, 0), (0, f_pad - fdim)))

    # Row tiling: large tiles when N is large (per-step overhead ~0.35 us),
    # otherwise a single sublane-aligned tile.  Pad N with zero rows (sliced
    # off below; zero rows never produce NaN since b2 makes y nonzero).
    tn = min(tile_n, _round_up(n, 8))
    n_pad = _round_up(n, tn)
    xp = jnp.pad(x, ((0, n_pad - n), (0, 0)))

    out = pl.pallas_call(
        _mlp_l2norm_kernel,
        out_shape=jax.ShapeDtypeStruct((n_pad, f_pad), jnp.float32),
        grid_spec=pltpu.PrefetchScalarGridSpec(
            num_scalar_prefetch=0,
            grid=(n_pad // tn,),
            in_specs=[
                pl.BlockSpec((tn, d), lambda i: (i, 0)),        # x tile
                pl.BlockSpec((d, h_pad), lambda i: (0, 0)),     # w1 (resident)
                pl.BlockSpec((1, h_pad), lambda i: (0, 0)),     # b1
                pl.BlockSpec((h_pad, f_pad), lambda i: (0, 0)),  # w2
                pl.BlockSpec((1, f_pad), lambda i: (0, 0)),     # b2
            ],
            out_specs=pl.BlockSpec((tn, f_pad), lambda i: (i, 0)),
        ),
        compiler_params=pltpu.CompilerParams(
            dimension_semantics=("parallel",),       # shard rows over TCs (v7x)
            vmem_limit_bytes=48 * 1024 * 1024,       # headroom on v7x's 64 MiB
        ),
    )(xp, w1p, b1p, w2p, b2p)
    return out[:n, :fdim]


# ----------------------------------------------------------------------------
# Parameter init (deterministic, PyTorch-Linear-style uniform init)
# ----------------------------------------------------------------------------
def _init_linear(key, d_in, d_out):
    kw, kb = jax.random.split(key)
    bound = 1.0 / jnp.sqrt(jnp.float32(d_in))
    w = jax.random.uniform(kw, (d_in, d_out), jnp.float32, -bound, bound)
    b = jax.random.uniform(kb, (1, d_out), jnp.float32, -bound, bound)
    return w, b


class JointModelPallas:
    """Pallas equivalent of JointModel's forward (MLP heads + L2 norm)."""

    def __init__(self, key, v_backbone_dim=32, l_backbone_dim=32,
                 v_hidden=32, l_hidden=32, cross_feature_dim=16):
        kv1, kv2, kl1, kl2 = jax.random.split(key, 4)
        # Visual head: Linear(backbone_dim, hdim) -> ReLU -> Dropout -> Linear(hdim, fdim)
        self.v_w1, self.v_b1 = _init_linear(kv1, v_backbone_dim, v_hidden)
        self.v_w2, self.v_b2 = _init_linear(kv2, v_hidden, cross_feature_dim)
        # Language head: same structure over BERT hidden states
        self.l_w1, self.l_b1 = _init_linear(kl1, l_backbone_dim, l_hidden)
        self.l_w2, self.l_b2 = _init_linear(kl2, l_hidden, cross_feature_dim)
        self.cross_feature_dim = cross_feature_dim

    def __call__(self, v_feat, l_feat):
        # TODO(synk): pretrained torchvision ResNet backbone (model.fc=Identity)
        # has no in-script Pallas equivalent; v_feat stands in for its pooled
        # output features [B, backbone_dim].
        v_out = mlp_l2norm(v_feat, self.v_w1, self.v_b1, self.v_w2, self.v_b2)

        # TODO(synk): HuggingFace BERT backbone + tokenizer not reproducible
        # in-script; l_feat stands in for backbone(...).last_hidden_state
        # with shape [B, S, hidden_size].
        B, S, D = l_feat.shape
        l_flat = l_feat.reshape(B * S, D)
        l_out = mlp_l2norm(l_flat, self.l_w1, self.l_b1, self.l_w2, self.l_b2)
        l_out = l_out.reshape(B, S, self.cross_feature_dim)

        return v_out, l_out


# ----------------------------------------------------------------------------
# Pure-JAX reference for correctness checks
# ----------------------------------------------------------------------------
def _ref_head(x, w1, b1, w2, b2):
    h = jnp.maximum(x @ w1 + b1, 0.0)
    y = h @ w2 + b2
    return y / jnp.linalg.norm(y, axis=-1, keepdims=True)


if __name__ == "__main__":
    key = jax.random.PRNGKey(0)
    k_model, k_v, k_l, k_x = jax.random.split(key, 4)

    B, S = 2, 8
    V_DIM, L_DIM, HID, FDIM = 32, 32, 32, 16

    model = JointModelPallas(k_model, v_backbone_dim=V_DIM, l_backbone_dim=L_DIM,
                             v_hidden=HID, l_hidden=HID, cross_feature_dim=FDIM)

    # Stand-ins for backbone outputs (see TODO comments above).
    v_feat = jax.random.normal(k_v, (B, V_DIM), jnp.float32)        # visual features
    l_feat = jax.random.normal(k_l, (B, S, L_DIM), jnp.float32)     # BERT hidden states

    v_out, l_out = model(v_feat, l_feat)
    jax.block_until_ready((v_out, l_out))

    # --- f32 correctness vs pure-JAX reference ------------------------------
    v_ref = _ref_head(v_feat, model.v_w1, model.v_b1, model.v_w2, model.v_b2)
    l_ref = _ref_head(l_feat.reshape(B * S, L_DIM),
                      model.l_w1, model.l_b1, model.l_w2, model.l_b2).reshape(B, S, FDIM)
    assert v_out.shape == (B, FDIM) and l_out.shape == (B, S, FDIM)
    assert jnp.allclose(v_out, v_ref, atol=1e-4, rtol=1e-4)
    assert jnp.allclose(l_out, l_ref, atol=1e-4, rtol=1e-4)

    # --- multi-tile grid path (row padding + several grid steps) ------------
    x_big = jax.random.normal(k_x, (40, V_DIM), jnp.float32)
    y_big = mlp_l2norm(x_big, model.v_w1, model.v_b1, model.v_w2, model.v_b2,
                       tile_n=16)                     # grid of 3 row tiles
    y_big_ref = _ref_head(x_big, model.v_w1, model.v_b1, model.v_w2, model.v_b2)
    assert y_big.shape == (40, FDIM)
    assert jnp.allclose(y_big, y_big_ref, atol=1e-4, rtol=1e-4)

    # --- bf16 feature/weight path (native bf16 MXU, f32 epilogue) -----------
    v_bf = v_feat.astype(jnp.bfloat16)
    wb = [p.astype(jnp.bfloat16)
          for p in (model.v_w1, model.v_b1, model.v_w2, model.v_b2)]
    y_bf = mlp_l2norm(v_bf, *wb)
    jax.block_until_ready(y_bf)
    assert y_bf.shape == (B, FDIM)
    assert bool(jnp.all(jnp.isfinite(y_bf)))
    row_norms = jnp.linalg.norm(y_bf.astype(jnp.float32), axis=-1)
    assert bool(jnp.all(jnp.abs(row_norms - 1.0) < 1e-2))

    print("KERNEL_OK")
</pallas_src>

<mosaic_0001>
module attributes {stable_mosaic.version = 11 : i64} {
  func.func @_mlp_l2norm_kernel(%arg0: i32, %arg1: memref<8x32xf32, #tpu.memory_space<vmem>>, %arg2: memref<32x128xf32, #tpu.memory_space<vmem>>, %arg3: memref<1x128xf32, #tpu.memory_space<vmem>>, %arg4: memref<128x128xf32, #tpu.memory_space<vmem>>, %arg5: memref<1x128xf32, #tpu.memory_space<vmem>>, %arg6: memref<8x128xf32, #tpu.memory_space<vmem>>) attributes {dimension_semantics = [#tpu.dimension_semantics<parallel>], iteration_bounds = array<i64: 1>, scalar_prefetch = 0 : i64, scratch_operands = 0 : i64, tpu.core_type = #tpu.core_type<tc>, window_params = [{transform_indices = @transform_0, window_bounds = array<i64: 8, 32>}, {pipeline_mode = #tpu.pipeline_mode<synchronous>, transform_indices = @transform_1, window_bounds = array<i64: 32, 128>}, {pipeline_mode = #tpu.pipeline_mode<synchronous>, transform_indices = @transform_2, window_bounds = array<i64: 1, 128>}, {pipeline_mode = #tpu.pipeline_mode<synchronous>, transform_indices = @transform_3, window_bounds = array<i64: 128, 128>}, {pipeline_mode = #tpu.pipeline_mode<synchronous>, transform_indices = @transform_4, window_bounds = array<i64: 1, 128>}, {transform_indices = @transform_5, window_bounds = array<i64: 8, 128>}]} {
    %c0 = arith.constant 0 : index
    %c0_0 = arith.constant 0 : index
    %0 = vector.load %arg1[%c0, %c0_0] : memref<8x32xf32, #tpu.memory_space<vmem>>, vector<8x32xf32>
    %c0_1 = arith.constant 0 : index
    %c0_2 = arith.constant 0 : index
    %1 = vector.load %arg2[%c0_1, %c0_2] : memref<32x128xf32, #tpu.memory_space<vmem>>, vector<32x128xf32>
    %cst = arith.constant dense<0.000000e+00> : vector<8x128xf32>
    %2 = tpu.matmul %0, %1, %cst {dimension_numbers = #tpu.dot_dimension_numbers<[1], [0], [0], [1], [0, 0, 1, 1], [], []>} : vector<8x32xf32>, vector<32x128xf32>, vector<8x128xf32> -> vector<8x128xf32>
    %c0_3 = arith.constant 0 : index
    %c0_4 = arith.constant 0 : index
    %3 = vector.load %arg3[%c0_3, %c0_4] : memref<1x128xf32, #tpu.memory_space<vmem>>, vector<1x128xf32>
    %4 = vector.broadcast %3 : vector<1x128xf32> to vector<8x128xf32>
    %5 = arith.addf %2, %4 : vector<8x128xf32>
    %cst_5 = arith.constant 0.000000e+00 : f32
    %6 = vector.broadcast %cst_5 : f32 to vector<8x128xf32>
    %7 = arith.maximumf %5, %6 : vector<8x128xf32>
    %c0_6 = arith.constant 0 : index
    %c0_7 = arith.constant 0 : index
    %8 = vector.load %arg4[%c0_6, %c0_7] : memref<128x128xf32, #tpu.memory_space<vmem>>, vector<128x128xf32>
    %cst_8 = arith.constant dense<0.000000e+00> : vector<8x128xf32>
    %9 = tpu.matmul %7, %8, %cst_8 {dimension_numbers = #tpu.dot_dimension_numbers<[1], [0], [0], [1], [0, 0, 1, 1], [], []>} : vector<8x128xf32>, vector<128x128xf32>, vector<8x128xf32> -> vector<8x128xf32>
    %c0_9 = arith.constant 0 : index
    %c0_10 = arith.constant 0 : index
    %10 = vector.load %arg5[%c0_9, %c0_10] : memref<1x128xf32, #tpu.memory_space<vmem>>, vector<1x128xf32>
    %11 = vector.broadcast %10 : vector<1x128xf32> to vector<8x128xf32>
    %12 = arith.addf %9, %11 : vector<8x128xf32>
    %13 = arith.mulf %12, %12 : vector<8x128xf32>
    %cst_11 = arith.constant dense<0.000000e+00> : vector<8xf32>
    %14 = vector.multi_reduction <add>, %13, %cst_11 [1] : vector<8x128xf32> to vector<8xf32>
    %15 = vector.shape_cast %14 : vector<8xf32> to vector<8x1xf32>
    %16 = math.rsqrt %15 : vector<8x1xf32>
    %17 = vector.broadcast %16 : vector<8x1xf32> to vector<8x128xf32>
    %18 = arith.mulf %12, %17 : vector<8x128xf32>
    %c0_12 = arith.constant 0 : index
    %c0_13 = arith.constant 0 : index
    %19 = vector.load %arg6[%c0_12, %c0_13] : memref<8x128xf32, #tpu.memory_space<vmem>>, vector<8x128xf32>
    tpu.vector_store %arg6[%c0_12, %c0_13], %18 {strides = array<i32>} : memref<8x128xf32, #tpu.memory_space<vmem>>, vector<8x128xf32>,
    return
  }
  func.func @transform_0(%arg0: i32) -> (i32, i32) {
    %c0_i32 = arith.constant 0 : i32
    %c0_i32_0 = arith.constant 0 : i32
    return %arg0, %c0_i32 : i32, i32
  }
  func.func @transform_1(%arg0: i32) -> (i32, i32) {
    %c0_i32 = arith.constant 0 : i32
    %c0_i32_0 = arith.constant 0 : i32
    %c0_i32_1 = arith.constant 0 : i32
    return %c0_i32, %c0_i32_0 : i32, i32
  }
  func.func @transform_2(%arg0: i32) -> (i32, i32) {
    %c0_i32 = arith.constant 0 : i32
    %c0_i32_0 = arith.constant 0 : i32
    %c0_i32_1 = arith.constant 0 : i32
    return %c0_i32, %c0_i32_0 : i32, i32
  }
  func.func @transform_3(%arg0: i32) -> (i32, i32) {
    %c0_i32 = arith.constant 0 : i32
    %c0_i32_0 = arith.constant 0 : i32
    %c0_i32_1 = arith.constant 0 : i32
    return %c0_i32, %c0_i32_0 : i32, i32
  }
  func.func @transform_4(%arg0: i32) -> (i32, i32) {
    %c0_i32 = arith.constant 0 : i32
    %c0_i32_0 = arith.constant 0 : i32
    %c0_i32_1 = arith.constant 0 : i32
    return %c0_i32, %c0_i32_0 : i32, i32
  }
  func.func @transform_5(%arg0: i32) -> (i32, i32) {
    %c0_i32 = arith.constant 0 : i32
    %c0_i32_0 = arith.constant 0 : i32
    return %arg0, %c0_i32 : i32, i32
  }
}

</mosaic_0001>

<bundles_post_ra>
// kernel: tpu_custom_call.1
= control target key start
LH: loop header
LB: loop body
LE: loop exit
PB: predicated region body
PF: predicated region fallthrough
CT: control target
= control target key end

     0   :  { %10 = vsyncpa [#allocation3], 0  ;;  %s567_s0 = inlined_call_operand.hbm [shape: f32[8,32], index: 0, kind: input, shape index: {}]   ;;  %s568_s1 = inlined_call_operand.hbm [shape: f32[32,128], index: 1, kind: input, shape index: {}]   ;;  %s569_s2 = inlined_call_operand.vmem [shape: f32[1,128], index: 2, kind: input, shape index: {}]   ;;  %s570_s3 = inlined_call_operand.hbm [shape: f32[128,128], index: 3, kind: input, shape index: {}]   ;;  %s571_s4 = inlined_call_operand.vmem [shape: f32[1,128], index: 4, kind: input, shape index: {}]   ;;  %s572_s5 = inlined_call_operand.hbm [shape: f32[8,128], index: 5, kind: output, shape index: {}]  }
   0x1   :  { %11 = vsyncpa [#allocation6], 0 }
   0x2   :  { %12 = vsyncpa [#allocation4], 0  ;;  %s468_s18 = smov [#allocation5]   ;;  %s374_s22 = scalar_lea.hbm %s568_s1, 512 }
   0x3   :  { %s28_s19 = sshll.u32 %s468_s18, 4  ;;  %p375_p0 = scmp.ne.s32.totalorder %s568_s1, %s374_s22  ;;  %s29_s19 = int_to_ptr.vmem [resolvable:$true] %s28_s19 }
   0x4   :  { %p378_p1 = scmp.lt.u32.totalorder %s374_s22, %s568_s1 }
   0x6   :  { %p380_p2 = pnand %p378_p1, %p375_p0 }
   0x8   :  { %383 = shalt.err (!%p380_p2)
}
   0x9   :  { %s384_s27 = scalar_lea.vmem %s29_s19, 512  ;;  %p389_p4 = scmp.lt.s32.totalorder %s29_s19, %s29_s19 }
   0xa   :  { %p385_p3 = scmp.ne.s32.totalorder %s29_s19, %s384_s27  ;;  %p390_p5 = scmp.lt.s32.totalorder %s384_s27, %s384_s27 }
   0xc   :  { %p391_p6 = por %p390_p5, %p389_p4 }
   0xe   :  { %p392_p7 = pnand %p391_p6, %p385_p3 }
  0x10   :  { %395 = shalt.err (!%p392_p7)
}
  0x11   :  { %s469_s28 = smov 128   ;;  %s470_s29 = smov 8  }
  0x12   :  { %34 = dma.hbm_to_vmem [thread:$0]  %s568_s1, 512, %s29_s19, [#allocation6], %s469_s28, %s469_s28, %s470_s29  }
  0x13   :  { %s471_s7 = smov [#allocation2]   ;;  %s472_s9 = smov [#allocation7]  }
  0x14   :  { %s19_s8 = sshll.u32 %s471_s7, 4  ;;  %s42_s10 = sshll.u32 %s472_s9, 4  ;;  %s20_s8 = int_to_ptr.vmem [resolvable:$true] %s19_s8  ;;  %s43_s10 = int_to_ptr.vmem [resolvable:$true] %s42_s10 }
  0x15   :  { %s396_s13 = scalar_lea.hbm %s567_s0, 128 }
  0x16   :  { %p397_p8 = scmp.ne.s32.totalorder %s567_s0, %s396_s13  ;;  %p400_p9 = scmp.lt.u32.totalorder %s396_s13, %s567_s0 }
  0x18   :  { %p402_p10 = pnand %p400_p9, %p397_p8 }
  0x1a   :  { %405 = shalt.err (!%p402_p10)
}
  0x1b   :  { %s406_s1 = scalar_lea.vmem %s20_s8, 128  ;;  %p411_p12 = scmp.lt.s32.totalorder %s20_s8, %s20_s8 }
  0x1c   :  { %p407_p11 = scmp.ne.s32.totalorder %s20_s8, %s406_s1  ;;  %p412_p13 = scmp.lt.s32.totalorder %s406_s1, %s406_s1 }
  0x1e   :  { %p413_p0 = por %p412_p13, %p411_p12 }
  0x20   :  { %p414_p1 = pnand %p413_p0, %p407_p11 }
  0x22   :  { %417 = shalt.err (!%p414_p1)
}
  0x23   :  { %22 = dma.hbm_to_vmem [thread:$0]  %s567_s0, 128, %s20_s8, [#allocation3]  }
  0x24   :  { %s418_s22 = scalar_lea.hbm %s570_s3, 2048 }
  0x25   :  { %p419_p2 = scmp.ne.s32.totalorder %s570_s3, %s418_s22  ;;  %p422_p3 = scmp.lt.u32.totalorder %s418_s22, %s570_s3 }
  0x27   :  { %p424_p4 = pnand %p422_p3, %p419_p2 }
  0x29   :  { %427 = shalt.err (!%p424_p4)
}
  0x2a   :  { %s428_s27 = scalar_lea.vmem %s43_s10, 2048  ;;  %p433_p6 = scmp.lt.s32.totalorder %s43_s10, %s43_s10 }
  0x2b   :  { %p429_p5 = scmp.ne.s32.totalorder %s43_s10, %s428_s27  ;;  %p434_p7 = scmp.lt.s32.totalorder %s428_s27, %s428_s27 }
  0x2d   :  { %p435_p8 = por %p434_p7, %p433_p6 }
  0x2f   :  { %p436_p9 = pnand %p435_p8, %p429_p5 }
  0x31   :  { %439 = shalt.err (!%p436_p9)
}
  0x32   :  { %48 = dma.hbm_to_vmem [thread:$0]  %s570_s3, 2048, %s43_s10, [#allocation6], %s469_s28, %s469_s28, %s470_s29  }
  0x33   :  { %462 = dma.done.wait [#allocation3], 128  }
  0x34   :  { %463 = vsyncadd [#allocation3], 4294967168 }
  0x35   :  { %464 = dma.done.wait [#allocation6], 2560  }
  0x36   :  { %465 = vsyncadd [#allocation6], 4294964736  ;;  %v473_v0 = vmov 0.0|0.0   ;;  %vm474_vm0 = vmmov 0   ;;  %v475_v1 = vmov 0.0   ;;  %v61_v2 = vld [vmem:[#allocation5] sm:$0xff] }
  0x37   :  { %333 = vmatprep.subr.bf16.mxu0 %v473_v0  ;;  %295 = vmatprep.mubr.msk.f32.mxu0 %vm474_vm0, %v475_v1  ;;  %v62_v3 = vld [vmem:[#allocation5 + $0x8] sm:$0xff]  ;;  %v63_v4 = vld [vmem:[#allocation5 + $0x10] sm:$0xff]  ;;  %v64_v6 = vld [vmem:[#allocation5 + $0x18] sm:$0xff]  ;;  %vm72_vm1 = vcmask 261120   ;;  %s476_s7 = smov [#allocation8]  }
  0x38   :  { %339 = vmatprep.subr.bf16.mxu1 %v473_v0  ;;  %330 = vmatprep.mubr.msk.f32.mxu1 %vm474_vm0, %v475_v1  ;;  %v334_v5 = vpack.c.bf16 %v62_v3, %v61_v2  ;;  %v147_v7 = vld [vmem:[#allocation7] sm:$0xff]  ;;  %v148_v8 = vld [vmem:[#allocation7 + $0x8] sm:$0xff]  ;;  %v149_v9 = vld [vmem:[#allocation7 + $0x10] sm:$0xff]  ;;  %v337_v11 = vpack.c.bf16 %v64_v6, %v63_v4  ;;  %s252_s8 = sshll.u32 %s476_s7, 4  ;;  %s253_s8 = int_to_ptr.vmem [resolvable:$true] %s252_s8 }
  0x39   :  { %v150_v10 = vld [vmem:[#allocation7 + $0x18] sm:$0xff]  ;;  %v340_v12 = vpack.c.bf16 %v148_v8, %v147_v7  ;;  %v151_v14 = vld [vmem:[#allocation7 + $0x20] sm:$0xff]  ;;  %v152_v15 = vld [vmem:[#allocation7 + $0x28] sm:$0xff]  ;;  %p445_p11 = scmp.lt.s32.totalorder %s253_s8, %s253_s8 }
  0x3a   :  { %335 = vmatpush3.bf16.msra.mxu0 %v334_v5  ;;  %v343_v13 = vpack.c.bf16 %v150_v10, %v149_v9  ;;  %v60_v16 = vld [vmem:[#allocation2] sm:$0xff]  ;;  %v346_v17 = vpack.c.bf16 %v152_v15, %v151_v14  ;;  %v153_v18 = vld [vmem:[#allocation7 + $0x30] sm:$0xff]  ;;  %v155_v21 = vld [vmem:[#allocation7 + $0x40] sm:$0xff] }
  0x3b   :  { %336 = vmatprep.subr.bf16.mxu0 %v473_v0  ;;  %341 = vmatpush3.bf16.msra.mxu1 %v340_v12  ;;  %v154_v19 = vld [vmem:[#allocation7 + $0x38] sm:$0xff]  ;;  %v156_v22 = vld [vmem:[#allocation7 + $0x48] sm:$0xff]  ;;  %v157_v24 = vld [vmem:[#allocation7 + $0x50] sm:$0xff] }
  0x3c   :  { %342 = vmatprep.subr.bf16.mxu1 %v473_v0  ;;  %v349_v20 = vpack.c.bf16 %v154_v19, %v153_v18  ;;  %v352_v23 = vpack.c.bf16 %v156_v22, %v155_v21  ;;  %v158_v25 = vld [vmem:[#allocation7 + $0x58] sm:$0xff]  ;;  %v159_v27 = vld [vmem:[#allocation7 + $0x60] sm:$0xff]  ;;  %v160_v28 = vld [vmem:[#allocation7 + $0x68] sm:$0xff] }
  0x3d   :  { %v355_v26 = vpack.c.bf16 %v158_v25, %v157_v24  ;;  %v358_v29 = vpack.c.bf16 %v160_v28, %v159_v27  ;;  %v161_v30 = vld [vmem:[#allocation7 + $0x70] sm:$0xff]  ;;  %v162_v31 = vld [vmem:[#allocation7 + $0x78] sm:$0xff] }
  0x3e   :  { %338 = vmatpush3.bf16.msra.mxu0 %v337_v11  ;;  %v361_v32 = vpack.c.bf16 %v162_v31, %v161_v30  ;;  %v262_v33 = vld [vmem:[%s569_s2] ss:$0 sm:$0xff]  ;;  %s440_s2 = scalar_lea.vmem %s253_s8, 128 }
  0x3f   :  { %344 = vmatpush3.bf16.msra.mxu1 %v343_v13  ;;  %v264_v38 = vld [vmem:[%s571_s4] ss:$0 sm:$0xff]  ;;  %p441_p10 = scmp.ne.s32.totalorder %s253_s8, %s440_s2  ;;  %p446_p12 = scmp.lt.s32.totalorder %s440_s2, %s440_s2 }
  0x40   :  { %345 = vmatprep.subr.bf16.mxu1 %v473_v0 }
  0x41   :  { %296 = vmatmul.mubr.msk.f32.vlgmr.msra.gmra.mrb[0].mxu0 %vm72_vm1, %v60_v16  ;;  %p447_p13 = por %p446_p12, %p445_p11 }
  0x43   :  { %347 = vmatpush3.bf16.msra.mxu1 %v346_v17  ;;  %p448_p0 = pnand %p447_p13, %p441_p10 }
  0x44   :  { %348 = vmatprep.subr.bf16.mxu1 %v473_v0 }
  0x47   :  { %350 = vmatpush3.bf16.msra.mxu1 %v349_v20 }
  0x48   :  { %351 = vmatprep.subr.bf16.mxu1 %v473_v0 }
  0x4b   :  { %353 = vmatpush3.bf16.msra.mxu1 %v352_v23 }
  0x4c   :  { %354 = vmatprep.subr.bf16.mxu1 %v473_v0 }
  0x4f   :  { %356 = vmatpush3.bf16.msra.mxu1 %v355_v26 }
  0x50   :  { %357 = vmatprep.subr.bf16.mxu1 %v473_v0 }
  0x53   :  { %359 = vmatpush3.bf16.msra.mxu1 %v358_v29 }
  0x54   :  { %360 = vmatprep.subr.bf16.mxu1 %v473_v0 }
  0x57   :  { %362 = vmatpush3.bf16.msra.mxu1 %v361_v32 }
 0x114   :  { %v142_v34 = vpop.f32.mrb[0].mxu0 }
 0x115   :  { %v143_v35 = vadd.f32 %v262_v33, %v142_v34  ;;  %v297_v36 = vpop.f32.mrb[1].mxu0 }
 0x117   :  { %v146_v37 = vmax.f32 %v143_v35, 0.0 }
 0x119   :  { %331 = vmatmul.mubr.f32.vlgmr.msra.gmra.mrb[0].mxu1 %v146_v37 }
 0x1ec   :  { %v236_v39 = vpop.f32.mrb[0].mxu1 }
 0x1ed   :  { %v237_v40 = vadd.f32 %v264_v38, %v236_v39  ;;  %v332_v41 = vpop.f32.mrb[1].mxu1 }
 0x1ef   :  { %v240_v42 = vmul.f32 %v237_v40, %v237_v40 }
 0x1f1   :  { %241 = vadd.xlane.f32.xlu0 %v240_v42 }
 0x27e   :  { %v242_v43 = vpop.xlane.xlu0 %241 }
 0x27f   :  { %372 = vrsqrt.f32 %v242_v43 }
 0x289   :  { %v373_v44 = vpop.eup %372 }
 0x28a   :  { %v244_v45 = vmul.f32 %v373_v44, %v237_v40 }
 0x28c   :  { %245 = vst [vmem:[#allocation8] sm:$0xff] %v244_v45 }
 0x28d   :  { %451 = shalt.err (!%p448_p0)
}
 0x28e   :  { %s452_s10 = scalar_lea.hbm %s572_s5, 128 }
 0x28f   :  { %p453_p1 = scmp.ne.s32.totalorder %s572_s5, %s452_s10  ;;  %p456_p2 = scmp.lt.u32.totalorder %s452_s10, %s572_s5 }
 0x291   :  { %p458_p3 = pnand %p456_p2, %p453_p1 }
 0x293   :  { %461 = shalt.err (!%p458_p3)
}
 0x294   :  { %255 = dma.vmem_to_hbm [thread:$0]  %s253_s8, 128, %s572_s5, [#allocation4]  }
 0x295   :  { %466 = dma.done.wait [#allocation4], 128  }
 0x296   :  { %467 = vsyncadd [#allocation4], 4294967168 }
 0x297   :  { %259 = vsyncpa [#allocation3], 1 }
 0x298   :  { %260 = vsyncpa [#allocation6], 1 }
 0x299   :  { %261 = vsyncpa [#allocation4], 1 }

</bundles_post_ra>
